<compile_context>
chip_gen: v7x
topology: tpu7x:2x2x1
jax: 0.10.0
libtpu: 0.0.40
codegen_flags: <defaults>
</compile_context>

<pallas_src>
import functools

import jax
import jax.numpy as jnp
from jax.experimental import pallas as pl
from jax.experimental.pallas import tpu as pltpu

LANE = 128
_PREP_CACHE = {}


# ----------------------------- kernels ---------------------------------------


def _fwd_logits(x_ref, w1_ref, b1_ref, w2_ref, b2_ref):
    """Shared forward: bf16 operands, f32 accumulation, f32 bias add.
    (x may arrive as f32 or bf16; the cast is a no-op for bf16 callers.)"""
    x = x_ref[...].astype(jnp.bfloat16)
    h_pre = jnp.dot(x, w1_ref[...], preferred_element_type=jnp.float32) + b1_ref[...]
    h = jnp.maximum(h_pre, 0.0)
    logits = (
        jnp.dot(h.astype(jnp.bfloat16), w2_ref[...],
                preferred_element_type=jnp.float32)
        + b2_ref[...]
    )
    return h_pre, logits


def _raw_grads(x_ref, w1_ref, b1_ref, w2_ref, b2_ref, w2t_ref, w1t_ref):
    """d(sum_i max_j logits)/d x, un-normalized; width = w1t's columns."""
    h_pre, logits = _fwd_logits(x_ref, w1_ref, b1_ref, w2_ref, b2_ref)

    # one-hot at the first per-row argmax (torch.max backward semantics),
    # computed on the f32-accumulated logits.
    max_l = jnp.max(logits, axis=-1, keepdims=True)
    col = jax.lax.broadcasted_iota(jnp.int32, logits.shape, 1)
    first = jnp.min(jnp.where(logits >= max_l, col, logits.shape[-1]),
                    axis=-1, keepdims=True)
    g_logits = (col == first).astype(jnp.bfloat16)

    # backward through the MLP; w2t/w1t are host-pre-transposed (no in-kernel .T)
    g_h = jnp.dot(g_logits, w2t_ref[...], preferred_element_type=jnp.float32)
    g_hpre = jnp.where(h_pre > 0.0, g_h, 0.0).astype(jnp.bfloat16)
    return jnp.dot(g_hpre, w1t_ref[...], preferred_element_type=jnp.float32)


def _abs_sum_2d(x):
    # (rows, cols) -> (1, 1); lane reduction first, then sublane.
    return jnp.sum(jnp.sum(jnp.abs(x), axis=1, keepdims=True), axis=0, keepdims=True)


def explain_fused_kernel(x_ref, w1_ref, b1_ref, w2_ref, b2_ref, w2t_ref, w1t_ref,
                         o_ref, *, b_real, inv_count):
    """Single-tile explain: relu(grads / mean(|grads|)); padded rows masked."""
    grads = _raw_grads(x_ref, w1_ref, b1_ref, w2_ref, b2_ref, w2t_ref, w1t_ref)
    if b_real < o_ref.shape[0]:
        row = jax.lax.broadcasted_iota(jnp.int32, grads.shape, 0)
        grads = jnp.where(row < b_real, grads, 0.0)
    mean_abs = jnp.maximum(_abs_sum_2d(grads) * inv_count, 1e-30)
    o_ref[...] = jnp.maximum(grads * (1.0 / mean_abs), 0.0)


def explain_grads_kernel(x_ref, w1_ref, b1_ref, w2_ref, b2_ref, w2t_ref, w1t_ref,
                         g_ref, psum_ref, *, tb, b_real, mask_rows):
    """Pass 1 (multi-tile, fully parallel): bf16 raw grads per batch tile plus a
    per-tile partial sum(|grads|) (reduced in the wrapper)."""
    grads = _raw_grads(x_ref, w1_ref, b1_ref, w2_ref, b2_ref, w2t_ref, w1t_ref)
    if mask_rows:
        row = (pl.program_id(0) * tb
               + jax.lax.broadcasted_iota(jnp.int32, grads.shape, 0))
        grads = jnp.where(row < b_real, grads, 0.0)
    g_ref[...] = grads.astype(g_ref.dtype)
    psum_ref[...] = _abs_sum_2d(grads).reshape(1, 1, 1)


def explain_norm_kernel(g_ref, scale_ref, o_ref):
    """Pass 2 (multi-tile): pure scale + ReLU stream; scale is an SMEM scalar."""
    o_ref[...] = jnp.maximum(g_ref[...].astype(jnp.float32) * scale_ref[0], 0.0)


def pred_softmax_kernel(x_ref, w1_ref, b1_ref, w2_ref, b2_ref, o_ref):
    """C > 1: softmax over (optionally class-padded) logits. Padded classes have
    zero weight columns and bias -1e30, so they carry exactly zero mass."""
    _, logits = _fwd_logits(x_ref, w1_ref, b1_ref, w2_ref, b2_ref)
    m = jnp.max(logits, axis=-1, keepdims=True)
    e = jnp.exp(logits - m)
    o_ref[...] = e / jnp.sum(e, axis=-1, keepdims=True)


def pred_sigmoid_kernel(x_ref, w1_ref, b1_ref, w2_ref, b2_ref, o_ref):
    """C == 1: probs = [1 - sigmoid(l), sigmoid(l)] written at exact width 2."""
    _, logits = _fwd_logits(x_ref, w1_ref, b1_ref, w2_ref, b2_ref)   # (tb, 1)
    p = jax.nn.sigmoid(logits)
    col = jax.lax.broadcasted_iota(jnp.int32, o_ref.shape, 1)
    o_ref[...] = jnp.where(col == 0, 1.0 - p, p)


# ----------------------------- wrapper ----------------------------------------


def _round_up(n, m):
    return ((n + m - 1) // m) * m


def _nbytes(*arrays):
    return sum(int(a.size) * a.dtype.itemsize for a in arrays)


def _vmem_caps():
    """(byte budget for our blocks, explicit scoped-VMEM compiler limit)."""
    cap = 64 << 20                                   # conservative default (v7x)
    try:
        info = pltpu.get_tpu_info()
        cap = int(getattr(info, "vmem_capacity_bytes", cap) or cap)
    except Exception:
        pass
    budget = int(cap * 0.40)                          # blocks we account for
    limit = max(32 << 20, min(int(cap * 0.75), 96 << 20))
    return budget, limit


def _choose_batch_tile(B, per_row_bytes, resident_bytes, budget, max_tile=None):
    """Largest batch tile that fits the VMEM budget; pad B up to a multiple of 8
    (single tile) or to tb*ntiles (multi-tile) instead of using tiny divisors."""
    cap = 1024
    if max_tile is not None:
        cap = max(8, (int(max_tile) // 8) * 8)
    avail = budget - resident_bytes
    fit = max(8, (avail // max(per_row_bytes, 1)) // 8 * 8) if avail > 0 else 8
    tb_fit = min(cap, fit)
    b8 = _round_up(B, 8)
    if b8 <= tb_fit:
        return b8, 1
    ntiles = -(-B // tb_fit)
    tb = _round_up(-(-B // ntiles), 8)
    return tb, ntiles


def _vmem_full():
    # Whole-array VMEM residency: loaded once, single-buffered (no block
    # pipeline) -> no duplicated weight buffers, no per-step weight DMA.
    return pl.BlockSpec(memory_space=pltpu.MemorySpace.VMEM)


def _prep_params(params):
    """Host-side weight prep (bf16 casts, pre-transposes, lane/H padding).
    Cached per parameter set so repeated calls pay it only once."""
    key = tuple(id(p) for p in params)
    hit = _PREP_CACHE.get(key)
    if hit is not None and all(a is b for a, b in zip(hit["src"], params)):
        return hit

    w1, b1, w2, b2 = params
    D, H = w1.shape
    C = w2.shape[1]
    Hp = _round_up(H, LANE)

    # explain output width: exact when narrow or already lane-dense, else padded
    Dw = D if (D % LANE == 0 or D < 2 * LANE) else _round_up(D, LANE)

    # pred output layout / head
    if C == 1:
        Cw, Ck = 2, 2
        head_w = jnp.pad(w2, ((0, Hp - H), (0, 0))).astype(jnp.bfloat16)
        head_b = b2
    elif C % LANE == 0 or C < 2 * LANE:
        Cw, Ck = C, C
        head_w = jnp.pad(w2, ((0, Hp - H), (0, 0))).astype(jnp.bfloat16)
        head_b = b2
    else:
        Cw, Ck = _round_up(C, LANE), C
        head_w = jnp.pad(w2, ((0, Hp - H), (0, Cw - C))).astype(jnp.bfloat16)
        head_b = jnp.pad(b2, ((0, 0), (0, Cw - C)), constant_values=-1e30)

    # hidden dim padded to a lane multiple (zero pads -> numerically inert)
    w1p = jnp.pad(w1, ((0, 0), (0, Hp - H))).astype(jnp.bfloat16)          # (D, Hp)
    b1p = jnp.pad(b1, ((0, 0), (0, Hp - H)))                               # (1, Hp)
    w2p = jnp.pad(w2, ((0, Hp - H), (0, 0))).astype(jnp.bfloat16)          # (Hp, C)
    w2t = jnp.pad(w2.T, ((0, 0), (0, Hp - H))).astype(jnp.bfloat16)        # (C, Hp)
    w1t = jnp.pad(w1.T, ((0, Hp - H), (0, Dw - D))).astype(jnp.bfloat16)   # (Hp, Dw)

    prep = dict(src=params, D=D, H=H, C=C, Hp=Hp, Dw=Dw, Cw=Cw, Ck=Ck,
                w1p=w1p, b1p=b1p, w2p=w2p, b2=b2, w2t=w2t, w1t=w1t,
                head_w=head_w, head_b=head_b)
    if len(_PREP_CACHE) > 8:
        _PREP_CACHE.clear()
    _PREP_CACHE[key] = prep
    return prep


def mlp_explainer(embeds, params, mode="explain", max_batch_tile=None):
    """Pallas equivalent of MLPExplainer.forward(embeds, mode)."""
    prep = _prep_params(params)
    B, D = embeds.shape
    Hp, C, Dw = prep["Hp"], prep["C"], prep["Dw"]
    budget, vmem_limit = _vmem_caps()
    xb = embeds.dtype.itemsize

    if mode == "explain":
        w_args = (prep["w1p"], prep["b1p"], prep["w2p"], prep["b2"],
                  prep["w2t"], prep["w1t"])
        resident = _nbytes(*w_args)
        # double-buffered x + bf16 grads blocks + f32 intermediates per row
        per_row = 2 * D * xb + 2 * 2 * Dw + 4 * (4 * Hp + 2 * Dw + 2 * C)
        tb, ntiles = _choose_batch_tile(B, per_row, resident, budget, max_batch_tile)
        B_pad = tb * ntiles
        x_pad = embeds if B_pad == B else jnp.pad(embeds, ((0, B_pad - B), (0, 0)))
        inv_count = 1.0 / float(B * D)
        flops = int(2 * B_pad * Hp * (D + 2 * C + Dw))

        if ntiles == 1:
            out = pl.pallas_call(
                functools.partial(explain_fused_kernel, b_real=B,
                                  inv_count=inv_count),
                out_shape=jax.ShapeDtypeStruct((B_pad, Dw), jnp.float32),
                in_specs=[_vmem_full()] * 7,
                out_specs=_vmem_full(),
                compiler_params=pltpu.CompilerParams(
                    vmem_limit_bytes=vmem_limit),
                cost_estimate=pl.CostEstimate(
                    flops=flops, transcendentals=0,
                    bytes_accessed=_nbytes(x_pad, *w_args) + B_pad * Dw * 4),
            )(x_pad, *w_args)
        else:
            # pass 1: bf16 raw grads + per-tile partial |grads| sums (parallel)
            grads_raw, psums = pl.pallas_call(
                functools.partial(explain_grads_kernel, tb=tb, b_real=B,
                                  mask_rows=B_pad > B),
                grid=(ntiles,),
                out_shape=(jax.ShapeDtypeStruct((B_pad, Dw), jnp.bfloat16),
                           jax.ShapeDtypeStruct((ntiles, 1, 1), jnp.float32)),
                in_specs=[pl.BlockSpec((tb, D), lambda i: (i, 0))]
                         + [_vmem_full()] * 6,
                out_specs=(pl.BlockSpec((tb, Dw), lambda i: (i, 0)),
                           pl.BlockSpec((1, 1, 1), lambda i: (i, 0, 0))),
                compiler_params=pltpu.CompilerParams(
                    dimension_semantics=("parallel",),
                    vmem_limit_bytes=vmem_limit),
                cost_estimate=pl.CostEstimate(
                    flops=flops, transcendentals=0,
                    bytes_accessed=_nbytes(x_pad, *w_args)
                                   + B_pad * Dw * 2 + ntiles * 4),
            )(x_pad, *w_args)

            # global normalization scalar, computed once in the wrapper
            scale = (1.0 / jnp.maximum(jnp.sum(psums) * inv_count, 1e-30)
                     ).reshape(1).astype(jnp.float32)

            # pass 2: scale + ReLU stream (scale lives in SMEM)
            out = pl.pallas_call(
                explain_norm_kernel,
                grid=(ntiles,),
                out_shape=jax.ShapeDtypeStruct((B_pad, Dw), jnp.float32),
                in_specs=[pl.BlockSpec((tb, Dw), lambda i: (i, 0)),
                          pl.BlockSpec(memory_space=pltpu.MemorySpace.SMEM)],
                out_specs=pl.BlockSpec((tb, Dw), lambda i: (i, 0)),
                compiler_params=pltpu.CompilerParams(
                    dimension_semantics=("parallel",),
                    vmem_limit_bytes=vmem_limit),
                cost_estimate=pl.CostEstimate(
                    flops=2 * B_pad * Dw, transcendentals=0,
                    bytes_accessed=B_pad * Dw * 6 + 4),
            )(grads_raw, scale)

        if B_pad == B and Dw == D:
            return out
        return out[:B, :D]

    elif mode == "pred":
        Cw, Ck = prep["Cw"], prep["Ck"]
        kernel = pred_sigmoid_kernel if C == 1 else pred_softmax_kernel
        w_args = (prep["w1p"], prep["b1p"], prep["head_w"], prep["head_b"])
        resident = _nbytes(*w_args)
        per_row = 2 * D * xb + 2 * 4 * Cw + 4 * (2 * Hp + 2 * Cw)
        tb, ntiles = _choose_batch_tile(B, per_row, resident, budget, max_batch_tile)
        B_pad = tb * ntiles
        x_pad = embeds if B_pad == B else jnp.pad(embeds, ((0, B_pad - B), (0, 0)))

        out = pl.pallas_call(
            kernel,
            grid=(ntiles,),
            out_shape=jax.ShapeDtypeStruct((B_pad, Cw), jnp.float32),
            in_specs=[pl.BlockSpec((tb, D), lambda i: (i, 0))]
                     + [_vmem_full()] * 4,
            out_specs=pl.BlockSpec((tb, Cw), lambda i: (i, 0)),
            compiler_params=pltpu.CompilerParams(
                dimension_semantics=("parallel",),
                vmem_limit_bytes=vmem_limit),
            cost_estimate=pl.CostEstimate(
                flops=int(2 * B_pad * Hp * (D + Cw)),
                transcendentals=int(B_pad * Cw),
                bytes_accessed=_nbytes(x_pad, *w_args) + B_pad * Cw * 4),
        )(x_pad, *w_args)

        if Cw != Ck:
            out = out[:, :Ck]
        return out[:B] if B_pad > B else out

    raise NotImplementedError(mode)


# --------------------------- references (plain JAX) ----------------------------


def _bf16_forward(x, params):
    """Precision-matched forward (same bf16-operand / f32-accumulate recipe)."""
    w1, b1, w2, b2 = params
    h_pre = jnp.dot(x.astype(jnp.bfloat16), w1.astype(jnp.bfloat16),
                    preferred_element_type=jnp.float32) + b1
    h = jnp.maximum(h_pre, 0.0)
    logits = jnp.dot(h.astype(jnp.bfloat16), w2.astype(jnp.bfloat16),
                     preferred_element_type=jnp.float32) + b2
    return h_pre, logits


def ref_explain(x, params):
    """Precision-matched reference for mode='explain'."""
    w1, b1, w2, b2 = params
    h_pre, logits = _bf16_forward(x, params)
    onehot = jax.nn.one_hot(jnp.argmax(logits, axis=-1), logits.shape[-1],
                            dtype=jnp.float32)
    g_h = jnp.dot(onehot.astype(jnp.bfloat16), w2.astype(jnp.bfloat16).T,
                  preferred_element_type=jnp.float32)
    g_hpre = g_h * (h_pre > 0.0).astype(jnp.float32)
    g = jnp.dot(g_hpre.astype(jnp.bfloat16), w1.astype(jnp.bfloat16).T,
                preferred_element_type=jnp.float32)
    g = g / jnp.mean(jnp.abs(g))
    return jnp.maximum(g, 0.0)


def ref_pred(x, params):
    """Precision-matched reference for mode='pred'."""
    _, logits = _bf16_forward(x, params)
    if logits.shape[1] == 1:
        p = jax.nn.sigmoid(logits)
        return jnp.concatenate([1.0 - p, p], axis=1)
    return jax.nn.softmax(logits, axis=-1)


def ref_explain_f32_autodiff(x, params):
    """Pure-f32 autodiff reference (validates the hand-derived backward)."""
    w1, b1, w2, b2 = params

    def loss(e):
        h = jnp.maximum(e @ w1 + b1, 0.0)
        return jnp.sum(jnp.max(h @ w2 + b2, axis=-1))

    g = jax.grad(loss)(x)
    g = g / jnp.mean(jnp.abs(g))
    return jnp.maximum(g, 0.0)


def ref_explain_f32_manual(x, params):
    """Same math as the kernels, pure f32 (compared against autodiff)."""
    w1, b1, w2, b2 = params
    h_pre = x @ w1 + b1
    logits = jnp.maximum(h_pre, 0.0) @ w2 + b2
    onehot = jax.nn.one_hot(jnp.argmax(logits, axis=-1), logits.shape[-1],
                            dtype=jnp.float32)
    g = ((onehot @ w2.T) * (h_pre > 0.0)) @ w1.T
    g = g / jnp.mean(jnp.abs(g))
    return jnp.maximum(g, 0.0)


# ------------------------------- main ------------------------------------------

if __name__ == "__main__":
    B, D, H, C = 8, 32, 64, 4
    key = jax.random.PRNGKey(0)
    k_x, k_w1, k_b1, k_w2, k_b2, k_x2, k_w2b, k_b2b = jax.random.split(key, 8)

    embeds = jax.random.normal(k_x, (B, D), dtype=jnp.float32)
    params = (
        jax.random.normal(k_w1, (D, H), dtype=jnp.float32) * 0.1,
        jax.random.normal(k_b1, (1, H), dtype=jnp.float32) * 0.1,
        jax.random.normal(k_w2, (H, C), dtype=jnp.float32) * 0.1,
        jax.random.normal(k_b2, (1, C), dtype=jnp.float32) * 0.1,
    )

    # single-tile (fused) explain + pred
    grads = jax.block_until_ready(mlp_explainer(embeds, params, mode="explain"))
    probs = jax.block_until_ready(mlp_explainer(embeds, params, mode="pred"))
    assert grads.shape == (B, D) and probs.shape == (B, C)

    # hand-derived backward == autodiff (pure f32, no kernels involved)
    assert jnp.allclose(ref_explain_f32_manual(embeds, params),
                        ref_explain_f32_autodiff(embeds, params),
                        atol=1e-5, rtol=1e-5)
    # kernels vs precision-matched (bf16-in / f32-accumulate) references
    assert jnp.allclose(grads, ref_explain(embeds, params), atol=1e-2, rtol=1e-2)
    assert jnp.allclose(probs, ref_pred(embeds, params), atol=1e-3, rtol=1e-3)
    assert jnp.allclose(jnp.sum(probs, axis=-1), 1.0, atol=1e-3)
    assert bool(jnp.all(jnp.isfinite(grads))) and bool(jnp.all(jnp.isfinite(probs)))

    # multi-tile two-pass explain + gridded pred: force a small batch tile so the
    # padded/masked multi-tile path is exercised (B=40 -> 3 tiles of 16, pad 48)
    B2 = 40
    embeds2 = jax.random.normal(k_x2, (B2, D), dtype=jnp.float32)
    grads2 = jax.block_until_ready(
        mlp_explainer(embeds2, params, mode="explain", max_batch_tile=16))
    probs2 = jax.block_until_ready(
        mlp_explainer(embeds2, params, mode="pred", max_batch_tile=16))
    assert grads2.shape == (B2, D) and probs2.shape == (B2, C)
    assert jnp.allclose(grads2, ref_explain(embeds2, params), atol=1e-2, rtol=1e-2)
    assert jnp.allclose(probs2, ref_pred(embeds2, params), atol=1e-3, rtol=1e-3)

    # binary head (C == 1): probs = [1 - sigmoid, sigmoid]
    params1 = (params[0], params[1],
               jax.random.normal(k_w2b, (H, 1), dtype=jnp.float32) * 0.1,
               jax.random.normal(k_b2b, (1, 1), dtype=jnp.float32) * 0.1)
    probs1 = jax.block_until_ready(mlp_explainer(embeds, params1, mode="pred"))
    assert probs1.shape == (B, 2)
    assert jnp.allclose(probs1, ref_pred(embeds, params1), atol=1e-3, rtol=1e-3)
    assert jnp.allclose(jnp.sum(probs1, axis=-1), 1.0, atol=1e-3)

    print("KERNEL_OK")
</pallas_src>

<mosaic_0001>
module attributes {stable_mosaic.version = 11 : i64} {
  func.func @explain_fused_kernel(%arg0: memref<8x32xf32, #tpu.memory_space<vmem>>, %arg1: memref<32x128xbf16, #tpu.memory_space<vmem>>, %arg2: memref<1x128xf32, #tpu.memory_space<vmem>>, %arg3: memref<128x4xbf16, #tpu.memory_space<vmem>>, %arg4: memref<1x4xf32, #tpu.memory_space<vmem>>, %arg5: memref<4x128xbf16, #tpu.memory_space<vmem>>, %arg6: memref<128x32xbf16, #tpu.memory_space<vmem>>, %arg7: memref<8x32xf32, #tpu.memory_space<vmem>>) attributes {dimension_semantics = [], scalar_prefetch = 0 : i64, scratch_operands = 0 : i64, tpu.core_type = #tpu.core_type<tc>} {
    %c0 = arith.constant 0 : index
    %c0_0 = arith.constant 0 : index
    %0 = vector.load %arg0[%c0, %c0_0] : memref<8x32xf32, #tpu.memory_space<vmem>>, vector<8x32xf32>
    %1 = arith.truncf %0 : vector<8x32xf32> to vector<8x32xbf16>
    %c0_1 = arith.constant 0 : index
    %c0_2 = arith.constant 0 : index
    %2 = vector.load %arg1[%c0_1, %c0_2] : memref<32x128xbf16, #tpu.memory_space<vmem>>, vector<32x128xbf16>
    %cst = arith.constant dense<0.000000e+00> : vector<8x128xf32>
    %3 = tpu.matmul %1, %2, %cst {dimension_numbers = #tpu.dot_dimension_numbers<[1], [0], [0], [1], [0, 0, 1, 1], [], []>} : vector<8x32xbf16>, vector<32x128xbf16>, vector<8x128xf32> -> vector<8x128xf32>
    %c0_3 = arith.constant 0 : index
    %c0_4 = arith.constant 0 : index
    %4 = vector.load %arg2[%c0_3, %c0_4] : memref<1x128xf32, #tpu.memory_space<vmem>>, vector<1x128xf32>
    %5 = vector.broadcast %4 : vector<1x128xf32> to vector<8x128xf32>
    %6 = arith.addf %3, %5 : vector<8x128xf32>
    %cst_5 = arith.constant 0.000000e+00 : f32
    %7 = vector.broadcast %cst_5 : f32 to vector<8x128xf32>
    %8 = arith.maximumf %6, %7 : vector<8x128xf32>
    %9 = arith.truncf %8 : vector<8x128xf32> to vector<8x128xbf16>
    %c0_6 = arith.constant 0 : index
    %c0_7 = arith.constant 0 : index
    %10 = vector.load %arg3[%c0_6, %c0_7] : memref<128x4xbf16, #tpu.memory_space<vmem>>, vector<128x4xbf16>
    %cst_8 = arith.constant dense<0.000000e+00> : vector<8x4xf32>
    %11 = tpu.matmul %9, %10, %cst_8 {dimension_numbers = #tpu.dot_dimension_numbers<[1], [0], [0], [1], [0, 0, 1, 1], [], []>} : vector<8x128xbf16>, vector<128x4xbf16>, vector<8x4xf32> -> vector<8x4xf32>
    %c0_9 = arith.constant 0 : index
    %c0_10 = arith.constant 0 : index
    %12 = vector.load %arg4[%c0_9, %c0_10] : memref<1x4xf32, #tpu.memory_space<vmem>>, vector<1x4xf32>
    %13 = vector.broadcast %12 : vector<1x4xf32> to vector<8x4xf32>
    %14 = arith.addf %11, %13 : vector<8x4xf32>
    %cst_11 = arith.constant dense<0xFF800000> : vector<8xf32>
    %15 = vector.multi_reduction <maximumf>, %14, %cst_11 [1] : vector<8x4xf32> to vector<8xf32>
    %16 = vector.shape_cast %15 : vector<8xf32> to vector<8x1xf32>
    %17 = tpu.iota {dimensions = array<i32: 1>} : vector<8x4xi32>
    %18 = vector.broadcast %16 : vector<8x1xf32> to vector<8x4xf32>
    %19 = arith.cmpf oge, %14, %18 : vector<8x4xf32>
    %c4_i32 = arith.constant 4 : i32
    %20 = vector.broadcast %c4_i32 : i32 to vector<8x4xi32>
    %21 = arith.select %19, %17, %20 : vector<8x4xi1>, vector<8x4xi32>
    %cst_12 = arith.constant dense<2147483647> : vector<8xi32>
    %22 = vector.multi_reduction <minsi>, %21, %cst_12 [1] : vector<8x4xi32> to vector<8xi32>
    %23 = vector.shape_cast %22 : vector<8xi32> to vector<8x1xi32>
    %24 = vector.broadcast %23 : vector<8x1xi32> to vector<8x4xi32>
    %25 = arith.cmpi eq, %17, %24 : vector<8x4xi32>
    %26 = arith.extui %25 : vector<8x4xi1> to vector<8x4xi32>
    %27 = arith.sitofp %26 : vector<8x4xi32> to vector<8x4xf32>
    %28 = arith.truncf %27 : vector<8x4xf32> to vector<8x4xbf16>
    %c0_13 = arith.constant 0 : index
    %c0_14 = arith.constant 0 : index
    %29 = vector.load %arg5[%c0_13, %c0_14] : memref<4x128xbf16, #tpu.memory_space<vmem>>, vector<4x128xbf16>
    %cst_15 = arith.constant dense<0.000000e+00> : vector<8x128xf32>
    %30 = tpu.matmul %28, %29, %cst_15 {dimension_numbers = #tpu.dot_dimension_numbers<[1], [0], [0], [1], [0, 0, 1, 1], [], []>} : vector<8x4xbf16>, vector<4x128xbf16>, vector<8x128xf32> -> vector<8x128xf32>
    %cst_16 = arith.constant 0.000000e+00 : f32
    %31 = vector.broadcast %cst_16 : f32 to vector<8x128xf32>
    %32 = arith.cmpf ogt, %6, %31 : vector<8x128xf32>
    %cst_17 = arith.constant 0.000000e+00 : f32
    %33 = vector.broadcast %cst_17 : f32 to vector<8x128xf32>
    %34 = arith.select %32, %30, %33 : vector<8x128xi1>, vector<8x128xf32>
    %35 = arith.truncf %34 : vector<8x128xf32> to vector<8x128xbf16>
    %c0_18 = arith.constant 0 : index
    %c0_19 = arith.constant 0 : index
    %36 = vector.load %arg6[%c0_18, %c0_19] : memref<128x32xbf16, #tpu.memory_space<vmem>>, vector<128x32xbf16>
    %cst_20 = arith.constant dense<0.000000e+00> : vector<8x32xf32>
    %37 = tpu.matmul %35, %36, %cst_20 {dimension_numbers = #tpu.dot_dimension_numbers<[1], [0], [0], [1], [0, 0, 1, 1], [], []>} : vector<8x128xbf16>, vector<128x32xbf16>, vector<8x32xf32> -> vector<8x32xf32>
    %38 = math.absf %37 : vector<8x32xf32>
    %cst_21 = arith.constant dense<0.000000e+00> : vector<8xf32>
    %39 = vector.multi_reduction <add>, %38, %cst_21 [1] : vector<8x32xf32> to vector<8xf32>
    %40 = vector.shape_cast %39 : vector<8xf32> to vector<8x1xf32>
    %cst_22 = arith.constant dense<0.000000e+00> : vector<1xf32>
    %41 = vector.multi_reduction <add>, %40, %cst_22 [0] : vector<8x1xf32> to vector<1xf32>
    %42 = vector.shape_cast %41 : vector<1xf32> to vector<1x1xf32>
    %cst_23 = arith.constant 3.906250e-03 : f32
    %43 = vector.broadcast %cst_23 : f32 to vector<1x1xf32>
    %44 = arith.mulf %42, %43 : vector<1x1xf32>
    %cst_24 = arith.constant 1.000000e-30 : f32
    %45 = vector.broadcast %cst_24 : f32 to vector<1x1xf32>
    %46 = arith.maximumf %44, %45 : vector<1x1xf32>
    %cst_25 = arith.constant 1.000000e+00 : f32
    %47 = vector.broadcast %cst_25 : f32 to vector<1x1xf32>
    %48 = arith.divf %47, %46 : vector<1x1xf32>
    %49 = vector.broadcast %48 : vector<1x1xf32> to vector<8x32xf32>
    %50 = arith.mulf %37, %49 : vector<8x32xf32>
    %cst_26 = arith.constant 0.000000e+00 : f32
    %51 = vector.broadcast %cst_26 : f32 to vector<8x32xf32>
    %52 = arith.maximumf %50, %51 : vector<8x32xf32>
    %c0_27 = arith.constant 0 : index
    %c0_28 = arith.constant 0 : index
    %53 = vector.load %arg7[%c0_27, %c0_28] : memref<8x32xf32, #tpu.memory_space<vmem>>, vector<8x32xf32>
    tpu.vector_store %arg7[%c0_27, %c0_28], %52 {strides = array<i32>} : memref<8x32xf32, #tpu.memory_space<vmem>>, vector<8x32xf32>,
    return
  }
}

</mosaic_0001>

<bundles_post_ra>
// kernel: tpu_custom_call.1
= control target key start
LH: loop header
LB: loop body
LE: loop exit
PB: predicated region body
PF: predicated region fallthrough
CT: control target
= control target key end

     0   :  { %v573_v1 = vmov 0.0   ;;  %vm574_vm0 = vmmov 0   ;;  %vm53_vm1 = vcmask 261120   ;;  %s732_s0 = inlined_call_operand.vmem [shape: f32[8,32], index: 0, kind: input, shape index: {}]   ;;  %s733_s1 = inlined_call_operand.vmem [shape: bf16[32,128], index: 1, kind: input, shape index: {}]   ;;  %s734_s2 = inlined_call_operand.vmem [shape: f32[1,128], index: 2, kind: input, shape index: {}]   ;;  %s735_s3 = inlined_call_operand.vmem [shape: bf16[128,4], index: 3, kind: input, shape index: {}]   ;;  %s736_s4 = inlined_call_operand.vmem [shape: f32[1,4], index: 4, kind: input, shape index: {}]   ;;  %s737_s5 = inlined_call_operand.vmem [shape: bf16[4,128], index: 5, kind: input, shape index: {}]   ;;  %s738_s6 = inlined_call_operand.vmem [shape: bf16[128,32], index: 6, kind: input, shape index: {}]   ;;  %s739_s7 = inlined_call_operand.hbm [shape: f32[8,32], index: 7, kind: output, shape index: {}]  }
   0x1   :  { %v529_v0 = vld [vmem:[%s733_s1] sm:$0xff]   ;;  %472 = vmatprep.subr.bf16.mxu1 %v573_v1  ;;  %v530_v2 = vld [vmem:[%s733_s1 + $0x8] sm:$0xff]   ;;  %500 = vmatprep.subr.bf16.mxu0 %v573_v1  ;;  %v533_v7 = vld [vmem:[%s735_s3 + $0x10] sm:$0xff]  }
   0x2   :  { %473 = vmatpush3.bf16.msra.mxu1 %v529_v0  ;;  %476 = vmatprep.mubr.msk.bf16.mxu1 %vm574_vm0, %v573_v1  ;;  %v28_v3 = vld [vmem:[%s732_s0] sm:$0xff]  ;;  %v532_v6 = vld [vmem:[%s735_s3 + $0x8] sm:$0xff]  }
   0x3   :  { %474 = vmatprep.subr.bf16.mxu1 %v573_v1  ;;  %502 = vmatprep.mubr.msk.bf16.mxu0 %vm574_vm0, %v573_v1  ;;  %v29_v4 = vpack.c.bf16 %v28_v3, %v28_v3  ;;  %v531_v5 = vld [vmem:[%s735_s3] sm:$0xff]  }
   0x6   :  { %475 = vmatpush3.bf16.msra.mxu1 %v530_v2 }
   0x7   :  { %480 = vmatprep.subr.bf16.mxu1 %v573_v1 }
   0x9   :  { %477 = vmatmul.mubr.msk.bf16.vlgmr.msra.gmra.mrb[0].mxu1 %vm53_vm1, %v29_v4 }
   0xa   :  { %481 = vmatpush3.bf16.msra.mxu1 %v531_v5  ;;  %496 = vmatprep.mubr.msk.bf16.mxu1 %vm574_vm0, %v573_v1 }
   0xb   :  { %482 = vmatprep.subr.bf16.mxu1 %v573_v1 }
   0xe   :  { %483 = vmatpush3.bf16.msra.mxu1 %v532_v6 }
   0xf   :  { %484 = vmatprep.subr.bf16.mxu1 %v573_v1 }
  0x10   :  { %12 = vsyncpa [#allocation3], 0  ;;  %v534_v8 = vld [vmem:[%s735_s3 + $0x18] sm:$0xff]   ;;  %v535_v9 = vld [vmem:[%s735_s3 + $0x20] sm:$0xff]   ;;  %vm210_vm2 = vcmask 31744   ;;  %v214_v28 = vlaneseq  ;;  %vm241_vm5 = vcmask 1041408  }
  0x11   :  { %v536_v10 = vld [vmem:[%s735_s3 + $0x28] sm:$0xff]   ;;  %v537_v11 = vld [vmem:[%s735_s3 + $0x30] sm:$0xff]   ;;  %v538_v12 = vld [vmem:[%s735_s3 + $0x38] sm:$0xff]  }
  0x12   :  { %485 = vmatpush3.bf16.msra.mxu1 %v533_v7  ;;  %v423_v13 = vld [vmem:[%s734_s2] ss:$0 sm:$0xff]  ;;  %v215_v29 = vand.u32 127, %v214_v28  ;;  %v540_v49 = vld [vmem:[%s738_s6 + $0x8] sm:$0xff]   ;;  %v541_v50 = vld [vmem:[%s738_s6 + $0x10] sm:$0xff]  }
  0x13   :  { %486 = vmatprep.subr.bf16.mxu1 %v573_v1  ;;  %v427_v21 = vld [vmem:[%s736_s4] ss:$0 sm:$0xff]  ;;  %v542_v51 = vld [vmem:[%s738_s6 + $0x18] sm:$0xff]   ;;  %v544_v53 = vld [vmem:[%s738_s6 + $0x28] sm:$0xff]  }
  0x14   :  { %v237_v39 = vld [vmem:[%s737_s5] sm:$0x3]  ;;  %v545_v54 = vld [vmem:[%s738_s6 + $0x30] sm:$0xff]   ;;  %v546_v55 = vld [vmem:[%s738_s6 + $0x38] sm:$0xff]  }
  0x15   :  { %v243_v40 = vsel %vm241_vm5, %v237_v39, 0  ;;  %v539_v47 = vld [vmem:[%s738_s6] sm:$0xff]  }
  0x16   :  { %487 = vmatpush3.bf16.msra.mxu1 %v534_v8  ;;  %501 = vmatpush3.bf16.msra.mxu0 %v243_v40  ;;  %v543_v52 = vld [vmem:[%s738_s6 + $0x20] sm:$0xff]   ;;  %s575_s6 = smov [#allocation2]  }
  0x17   :  { %488 = vmatprep.subr.bf16.mxu1 %v573_v1  ;;  %506 = vmatprep.subr.bf16.mxu0 %v573_v1  ;;  %s415_s14 = sshll.u32 %s575_s6, 4  ;;  %s416_s14 = int_to_ptr.vmem [resolvable:$true] %s415_s14 }
  0x18   :  { %s549_s15 = scalar_lea.vmem %s416_s14, 128  ;;  %p554_p1 = scmp.lt.s32.totalorder %s416_s14, %s416_s14 }
  0x19   :  { %p550_p0 = scmp.ne.s32.totalorder %s416_s14, %s549_s15  ;;  %p555_p2 = scmp.lt.s32.totalorder %s549_s15, %s549_s15 }
  0x1a   :  { %489 = vmatpush3.bf16.msra.mxu1 %v535_v9 }
  0x1b   :  { %490 = vmatprep.subr.bf16.mxu1 %v573_v1  ;;  %p556_p3 = por %p555_p2, %p554_p1 }
  0x1d   :  { %p557_p4 = pnand %p556_p3, %p550_p0 }
  0x1e   :  { %491 = vmatpush3.bf16.msra.mxu1 %v536_v10 }
  0x1f   :  { %492 = vmatprep.subr.bf16.mxu1 %v573_v1 }
  0x22   :  { %493 = vmatpush3.bf16.msra.mxu1 %v537_v11 }
  0x23   :  { %494 = vmatprep.subr.bf16.mxu1 %v573_v1 }
  0x26   :  { %495 = vmatpush3.bf16.msra.mxu1 %v538_v12 }
  0xdc   :  { %v91_v14 = vpop.f32.mrb[0].mxu1 }
  0xdd   :  { %v670_v15 = vadd.f32 %v423_v13, %v91_v14  ;;  %v478_v16 = vpop.f32.mrb[1].mxu1 }
  0xde   :  { %v94_v17 = vpop.f32.mrb[2].mxu1 }
  0xdf   :  { %v97_v18 = vmax.f32 %v670_v15, 0.0  ;;  %v479_v19 = vpop.f32.mrb[3].mxu1  ;;  %vm285_vm7 = vcmp.gt.f32.partialorder %v670_v15, 0.0 }
  0xe0   :  { %vm446_vm8 = vmpackc.low %vm285_vm7, %vm285_vm7 }
  0xe1   :  { %v98_v20 = vpack.c.bf16 %v97_v18, %v97_v18 }
  0xe3   :  { %497 = vmatmul.mubr.bf16.vlgmr.msra.gmra.mrb[4].mxu1 %v98_v20 }
 0x1b6   :  { %v204_v22 = vpop.f32.mrb[4].mxu1 }
 0x1b7   :  { %v205_v23 = vadd.f32 %v427_v21, %v204_v22  ;;  %v498_v24 = vpop.f32.mrb[5].mxu1 }
 0x1b8   :  { %v207_v25 = vpop.f32.mrb[6].mxu1 }
 0x1b9   :  { %v499_v26 = vpop.f32.mrb[7].mxu1  ;;  %v211_v27 = vsel %vm210_vm2, %v205_v23, -inf }
 0x1ba   :  { %212 = vmax.xlane.f32.xlu0 %v211_v27 }
 0x247   :  { %v213_v30 = vpop.xlane.xlu0 %212 }
 0x248   :  { %vm216_vm3 = vcmp.ge.f32.partialorder %v205_v23, %v213_v30 }
 0x249   :  { %v217_v31 = vsel %vm216_vm3, %v215_v29, 4 }
 0x24a   :  { %v218_v32 = vsel %vm210_vm2, %v217_v31, 2147483647 }
 0x24b   :  { %v220_v33 = vshra.s32 %v218_v32, 16  ;;  %v219_v35 = vand.u32 65535, %v218_v32 }
 0x24d   :  { %v222_v34 = vcvt.s32.f32 %v220_v33  ;;  %v221_v37 = vcvt.s32.f32 %v219_v35 }
 0x24f   :  { %223 = vmin.xlane.f32.xlu0 %v222_v34 }
 0x2dc   :  { %v224_v36 = vpop.xlane.xlu0 %223 }
 0x2dd   :  { %vm225_vm4 = vcmp.eq.f32.partialorder %v222_v34, %v224_v36  ;;  %v230_v41 = vcvt.f32.s32 %v224_v36 }
 0x2de   :  { %v226_v38 = vsel %vm225_vm4, %v221_v37, inf }
 0x2df   :  { %227 = vmin.xlane.f32.xlu1 %v226_v38  ;;  %v231_v43 = vshll.u32 %v230_v41, 16 }
 0x36c   :  { %v228_v42 = vpop.xlane.xlu1 %227 }
 0x36d   :  { %v229_v44 = vcvt.f32.s32 %v228_v42 }
 0x36f   :  { %v232_v45 = vadd.s32 %v231_v43, %v229_v44 }
 0x371   :  { %vm233_vm6 = vcmp.eq.s32.totalorder %v215_v29, %v232_v45 }
 0x372   :  { %v436_v46 = vsel %vm233_vm6, 1.0, %v573_v1 }
 0x373   :  { %v236_v48 = vpack.c.bf16 %v436_v46, %v436_v46 }
 0x375   :  { %503 = vmatmul.mubr.msk.bf16.vlgmr.msra.gmra.mrb[0].mxu0 %vm210_vm2, %v236_v48 }
 0x376   :  { %507 = vmatpush3.bf16.msra.mxu0 %v539_v47  ;;  %522 = vmatprep.mubr.msk.bf16.mxu0 %vm574_vm0, %v573_v1 }
 0x377   :  { %508 = vmatprep.subr.bf16.mxu0 %v573_v1 }
 0x37a   :  { %509 = vmatpush3.bf16.msra.mxu0 %v540_v49 }
 0x37b   :  { %510 = vmatprep.subr.bf16.mxu0 %v573_v1 }
 0x37e   :  { %511 = vmatpush3.bf16.msra.mxu0 %v541_v50 }
 0x37f   :  { %512 = vmatprep.subr.bf16.mxu0 %v573_v1 }
 0x382   :  { %513 = vmatpush3.bf16.msra.mxu0 %v542_v51 }
 0x383   :  { %514 = vmatprep.subr.bf16.mxu0 %v573_v1 }
 0x386   :  { %515 = vmatpush3.bf16.msra.mxu0 %v543_v52 }
 0x387   :  { %516 = vmatprep.subr.bf16.mxu0 %v573_v1 }
 0x38a   :  { %517 = vmatpush3.bf16.msra.mxu0 %v544_v53 }
 0x38b   :  { %518 = vmatprep.subr.bf16.mxu0 %v573_v1 }
 0x38e   :  { %519 = vmatpush3.bf16.msra.mxu0 %v545_v54 }
 0x38f   :  { %520 = vmatprep.subr.bf16.mxu0 %v573_v1 }
 0x392   :  { %521 = vmatpush3.bf16.msra.mxu0 %v546_v55 }
 0x448   :  { %v279_v56 = vpop.f32.mrb[0].mxu0 }
 0x449   :  { %v447_v57 = vpack.c.bf16 %v279_v56, %v279_v56  ;;  %v504_v58 = vpop.f32.mrb[1].mxu0 }
 0x44a   :  { %v282_v59 = vpop.f32.mrb[2].mxu0 }
 0x44b   :  { %v505_v60 = vpop.f32.mrb[3].mxu0  ;;  %523 = vmatmul.mubr.msk.bf16.vlgmr.msra.gmra.mrb[4].mxu0 %vm446_vm8, %v447_v57 }
 0x51e   :  { %v386_v61 = vpop.f32.mrb[4].mxu0 }
 0x51f   :  { %v392_v62 = vand.u32 2147483647, %v386_v61  ;;  %v524_v63 = vpop.f32.mrb[5].mxu0 }
 0x520   :  { %v389_v0 = vpop.f32.mrb[6].mxu0 }
 0x521   :  { %v525_v2 = vpop.f32.mrb[7].mxu0  ;;  %v393_v1 = vsel %vm53_vm1, %v392_v62, 0.0 }
 0x522   :  { %394 = vadd.xlane.f32.xlu1 %v393_v1 }
 0x5af   :  { %v395_v3 = vpop.xlane.xlu1 %394 }
 0x5b0   :  { %v396_v4 = vrot.slane %v395_v3, 4 }
 0x5b2   :  { %v397_v5 = vadd.f32 %v396_v4, %v395_v3 }
 0x5b4   :  { %v398_v6 = vrot.slane %v397_v5, 2 }
 0x5b6   :  { %v399_v7 = vadd.f32 %v398_v6, %v397_v5 }
 0x5b8   :  { %v400_v8 = vrot.slane %v399_v7, 1 }
 0x5ba   :  { %v401_v9 = vadd.f32 %v400_v8, %v399_v7 }
 0x5bc   :  { %v402_v10 = vmul.f32 0.00390625, %v401_v9 }
 0x5be   :  { %v403_v11 = vmax.f32 %v402_v10, 1e-30 }
 0x5c0   :  { %547 = vrcp.f32 %v403_v11 }
 0x5ca   :  { %v548_v12 = vpop.eup %547 }
 0x5cb   :  { %v406_v13 = vmul.f32 %v548_v12, %v386_v61 }
 0x5cd   :  { %v407_v14 = vmax.f32 %v406_v13, 0.0 }
 0x5cf   :  { %408 = vst.msk [vmem:[#allocation2] sm:$0xff] %vm53_vm1, %v407_v14 }
 0x5d0   :  { %560 = shalt.err (!%p557_p4)
}
 0x5d1   :  { %s561_s18 = scalar_lea.hbm %s739_s7, 128 }
 0x5d2   :  { %p562_p5 = scmp.ne.s32.totalorder %s739_s7, %s561_s18  ;;  %p565_p6 = scmp.lt.u32.totalorder %s561_s18, %s739_s7 }
 0x5d4   :  { %p567_p7 = pnand %p565_p6, %p562_p5 }
 0x5d6   :  { %570 = shalt.err (!%p567_p7)
}
 0x5d7   :  { %418 = dma.vmem_to_hbm [thread:$0]  %s416_s14, 128, %s739_s7, [#allocation3]  }
 0x5d8   :  { %571 = dma.done.wait [#allocation3], 128  }
 0x5d9   :  { %572 = vsyncadd [#allocation3], 4294967168 }
 0x5da   :  { %422 = vsyncpa [#allocation3], 1 }

</bundles_post_ra>
